<compile_context>
chip_gen: v5e
topology: v5e:2x2
jax: 0.10.0
libtpu: 0.0.40
codegen_flags: <defaults>
</compile_context>

<pallas_src>
import functools
import math

import jax
import jax.numpy as jnp
from jax.experimental import pallas as pl
from jax.experimental.pallas import tpu as pltpu


def _round_up(x: int, m: int) -> int:
    return (x + m - 1) // m * m


def _energy_alpha_kernel(nll_ref, logfz_ref, bias_ref, out_ref, *,
                         S, alpha, tile_s, tiles_per_split):
    # nll_ref:   [n, tile_s]  native dtype (pred_losses with trailing 1 squeezed)
    # logfz_ref: [n, tile_s]  native dtype
    # bias_ref:  [n, 1]       f32, = -(alpha/N) * log_f_hat  (resident across tiles)
    # out_ref:   [8, 128]     f32 accumulator block for this split; every element
    #                         carries the running sum of per-column logsumexp.
    i = pl.program_id(0)                 # split index          ("parallel")
    j = pl.program_id(1)                 # tile within split    ("arbitrary")
    global_tile = i * tiles_per_split + j

    nll = nll_ref[...].astype(jnp.float32)
    logfz = logfz_ref[...].astype(jnp.float32)
    bias = bias_ref[...]                                        # [n, 1] f32

    # inner_term = alpha * (-pred_losses.sum(-1) - (1/N) * log_f_hat - log_f_hat_z)
    inner = alpha * (-nll - logfz) + bias                       # [n, tile_s]

    # Lane-validity mask: columns past S (block padding / redundant clamped tiles).
    col = global_tile * tile_s + jax.lax.broadcasted_iota(jnp.int32, inner.shape, 1)
    valid = col < S
    inner = jnp.where(valid, inner, 0.0)

    # logsumexp over the sample axis (dim 0), guarded against all -inf columns.
    m = jnp.max(inner, axis=0, keepdims=True)                   # [1, tile_s]
    m_safe = jnp.where(m == -jnp.inf, 0.0, m)
    lse = m + jnp.log(jnp.sum(jnp.exp(inner - m_safe), axis=0, keepdims=True))
    lse = jnp.where(valid[:1, :], lse, 0.0)                     # zero padded columns
    tile_sum = jnp.sum(lse)                                     # scalar

    @pl.when(j == 0)
    def _():
        out_ref[...] = jnp.zeros_like(out_ref)

    out_ref[...] += tile_sum


def energy_alpha_divergence(pred_losses, log_f_hat, log_Z_prior,
                            log_normalizer, log_normalizer_z, log_f_hat_z,
                            *, N, alpha=1.0, tile_s=1024, num_splits=2):
    """Pallas implementation of EnergyAlphaDivergence.forward. Returns a 0-dim scalar."""
    n_samples = pred_losses.shape[0]
    S = pred_losses.shape[1]
    assert log_f_hat.shape == (n_samples,)
    assert log_f_hat_z.shape == (n_samples, S)

    # Squeeze the trailing size-1 dim (free reshape) instead of summing a 1-wide
    # lane axis inside the kernel. Keep native dtype for the big operands.
    if pred_losses.ndim == 3 and pred_losses.shape[-1] == 1:
        nll = pred_losses.reshape(n_samples, S)
    else:
        nll = jnp.sum(pred_losses, axis=-1)
    logfz = log_f_hat_z

    # Fold alpha * (-(1/N) * log_f_hat) into a tiny resident f32 bias.
    bias = (-(float(alpha) / float(N)) * log_f_hat.astype(jnp.float32)
            ).reshape(n_samples, 1)

    tile_s = min(int(tile_s), _round_up(S, 128))
    num_tiles = pl.cdiv(S, tile_s)
    tiles_per_split = pl.cdiv(num_tiles, num_splits)

    kernel = functools.partial(
        _energy_alpha_kernel, S=S, alpha=float(alpha),
        tile_s=tile_s, tiles_per_split=tiles_per_split)

    def tile_map(i, j):
        # Clamp redundant tiles to the last valid block; the kernel masks them out.
        return (0, jnp.minimum(i * tiles_per_split + j, num_tiles - 1))

    bytes_accessed = (n_samples * S * (nll.dtype.itemsize + logfz.dtype.itemsize)
                      + n_samples * 4 + num_splits * 8 * 128 * 4)
    cost = pl.CostEstimate(flops=6 * n_samples * S,
                           transcendentals=(n_samples + 1) * S,
                           bytes_accessed=bytes_accessed)

    out = pl.pallas_call(
        kernel,
        out_shape=jax.ShapeDtypeStruct((num_splits * 8, 128), jnp.float32),
        grid_spec=pltpu.PrefetchScalarGridSpec(
            num_scalar_prefetch=0,
            grid=(num_splits, tiles_per_split),
            in_specs=[
                pl.BlockSpec((n_samples, tile_s), tile_map),          # nll
                pl.BlockSpec((n_samples, tile_s), tile_map),          # log_f_hat_z
                pl.BlockSpec((n_samples, 1), lambda i, j: (0, 0)),    # bias (resident)
            ],
            out_specs=pl.BlockSpec((8, 128), lambda i, j: (i, 0)),
        ),
        compiler_params=pltpu.CompilerParams(
            dimension_semantics=("parallel", "arbitrary"),
            vmem_limit_bytes=32 * 1024 * 1024,
        ),
        cost_estimate=cost,
    )(nll, logfz, bias)

    # Combine per-split partials + free scalar epilogue in plain XLA.
    total = jnp.sum(out[0::8, 0])                       # sum of per-column logsumexp
    NoverS = float(N) / float(S)
    term = total + float(S) * math.log(1.0 / n_samples)
    loss = (-(1.0 / float(alpha)) * NoverS * term
            - log_normalizer.astype(jnp.float32)
            - NoverS * log_normalizer_z.astype(jnp.float32)
            + log_Z_prior.astype(jnp.float32))
    return loss * (1.0 / float(N))


def _reference(pred_losses, log_f_hat, log_Z_prior, log_normalizer,
               log_normalizer_z, log_f_hat_z, *, N, alpha=1.0):
    """Plain-JAX reference mirroring the PyTorch module exactly."""
    S = pred_losses.shape[1]
    n_samples = pred_losses.shape[0]
    NoverS = N / S
    inner = alpha * (-pred_losses.sum(-1)
                     - (1.0 / N) * log_f_hat[:, None]
                     - log_f_hat_z)
    loss = (-(1.0 / alpha) * NoverS
            * jnp.sum(jax.nn.logsumexp(inner, axis=0) + jnp.log(1.0 / n_samples), axis=0)
            - log_normalizer - NoverS * log_normalizer_z + log_Z_prior)
    return loss * (1.0 / N)


if __name__ == "__main__":
    key = jax.random.PRNGKey(0)
    k1, k2, k3, k4, k5, k6 = jax.random.split(key, 6)

    # --- Config A: f32, single tile, EnergyAlphaDivergence(N=100, alpha=1.0) ---
    N_train, alpha = 100, 1.0
    num_samples, batch_size = 8, 16
    pred_losses = jax.random.normal(k1, (num_samples, batch_size, 1), jnp.float32)
    log_f_hat = jax.random.normal(k2, (num_samples,), jnp.float32)
    log_f_hat_z = jax.random.normal(k3, (num_samples, batch_size), jnp.float32)
    log_Z_prior = jax.random.normal(k4, (), jnp.float32)
    log_normalizer = jax.random.normal(k5, (), jnp.float32)
    log_normalizer_z = jax.random.normal(k6, (), jnp.float32)

    out_a = energy_alpha_divergence(
        pred_losses, log_f_hat, log_Z_prior, log_normalizer,
        log_normalizer_z, log_f_hat_z, N=N_train, alpha=alpha)
    out_a = jax.block_until_ready(out_a)
    ref_a = _reference(
        pred_losses, log_f_hat, log_Z_prior, log_normalizer,
        log_normalizer_z, log_f_hat_z, N=N_train, alpha=alpha)
    assert out_a.shape == ()
    assert jnp.allclose(out_a, ref_a, rtol=1e-5, atol=1e-5), (out_a, ref_a)

    # --- Config B: bf16 inputs, multi-tile batch (exercises masking + splits) ---
    N2, alpha2 = 500, 0.5
    ns2, bs2 = 8, 300
    kb = jax.random.split(jax.random.PRNGKey(0), 6)
    pred2 = jax.random.normal(kb[0], (ns2, bs2, 1), jnp.float32).astype(jnp.bfloat16)
    logf2 = jax.random.normal(kb[1], (ns2,), jnp.float32)
    logfz2 = jax.random.normal(kb[2], (ns2, bs2), jnp.float32).astype(jnp.bfloat16)
    zp2 = jax.random.normal(kb[3], (), jnp.float32)
    ln2 = jax.random.normal(kb[4], (), jnp.float32)
    lnz2 = jax.random.normal(kb[5], (), jnp.float32)

    out_b = energy_alpha_divergence(
        pred2, logf2, zp2, ln2, lnz2, logfz2, N=N2, alpha=alpha2, tile_s=128)
    out_b = jax.block_until_ready(out_b)
    ref_b = _reference(
        pred2.astype(jnp.float32), logf2, zp2, ln2, lnz2,
        logfz2.astype(jnp.float32), N=N2, alpha=alpha2)
    assert out_b.shape == ()
    assert jnp.allclose(out_b, ref_b, rtol=1e-4, atol=1e-4), (out_b, ref_b)

    print("KERNEL_OK")
</pallas_src>

<mosaic_0001>
module attributes {stable_mosaic.version = 11 : i64} {
  func.func @_energy_alpha_kernel(%arg0: i32, %arg1: i32, %arg2: memref<8x128xf32, #tpu.memory_space<vmem>>, %arg3: memref<8x128xf32, #tpu.memory_space<vmem>>, %arg4: memref<8x1xf32, #tpu.memory_space<vmem>>, %arg5: memref<8x128xf32, #tpu.memory_space<vmem>>) attributes {dimension_semantics = [#tpu.dimension_semantics<parallel>, #tpu.dimension_semantics<arbitrary>], iteration_bounds = array<i64: 2, 1>, scalar_prefetch = 0 : i64, scratch_operands = 0 : i64, tpu.core_type = #tpu.core_type<tc>, window_params = [{transform_indices = @transform_0, window_bounds = array<i64: 8, 128>}, {transform_indices = @transform_1, window_bounds = array<i64: 8, 128>}, {pipeline_mode = #tpu.pipeline_mode<synchronous>, transform_indices = @transform_2, window_bounds = array<i64: 8, 1>}, {transform_indices = @transform_3, window_bounds = array<i64: 8, 128>}]} {
    %c1_i32 = arith.constant 1 : i32
    %0 = arith.muli %arg0, %c1_i32 : i32
    %1 = arith.addi %0, %arg1 : i32
    %c0 = arith.constant 0 : index
    %c0_0 = arith.constant 0 : index
    %2 = vector.load %arg2[%c0, %c0_0] : memref<8x128xf32, #tpu.memory_space<vmem>>, vector<8x128xf32>
    %c0_1 = arith.constant 0 : index
    %c0_2 = arith.constant 0 : index
    %3 = vector.load %arg3[%c0_1, %c0_2] : memref<8x128xf32, #tpu.memory_space<vmem>>, vector<8x128xf32>
    %c0_3 = arith.constant 0 : index
    %c0_4 = arith.constant 0 : index
    %4 = vector.load %arg4[%c0_3, %c0_4] : memref<8x1xf32, #tpu.memory_space<vmem>>, vector<8x1xf32>
    %cst = arith.constant 0.000000e+00 : f32
    %5 = vector.broadcast %cst : f32 to vector<8x128xf32>
    %6 = arith.subf %5, %2 : vector<8x128xf32>
    %7 = arith.subf %6, %3 : vector<8x128xf32>
    %cst_5 = arith.constant 1.000000e+00 : f32
    %8 = vector.broadcast %cst_5 : f32 to vector<8x128xf32>
    %9 = arith.mulf %8, %7 : vector<8x128xf32>
    %10 = vector.broadcast %4 : vector<8x1xf32> to vector<8x128xf32>
    %11 = arith.addf %9, %10 : vector<8x128xf32>
    %c128_i32 = arith.constant 128 : i32
    %12 = arith.muli %1, %c128_i32 : i32
    %13 = tpu.iota {dimensions = array<i32: 1>} : vector<8x128xi32>
    %14 = vector.broadcast %12 : i32 to vector<8x128xi32>
    %15 = arith.addi %14, %13 : vector<8x128xi32>
    %c16_i32 = arith.constant 16 : i32
    %16 = vector.broadcast %c16_i32 : i32 to vector<8x128xi32>
    %17 = arith.cmpi slt, %15, %16 : vector<8x128xi32>
    %cst_6 = arith.constant 0.000000e+00 : f32
    %18 = vector.broadcast %cst_6 : f32 to vector<8x128xf32>
    %19 = arith.select %17, %11, %18 : vector<8x128xi1>, vector<8x128xf32>
    %cst_7 = arith.constant dense<0xFF800000> : vector<128xf32>
    %20 = vector.multi_reduction <maximumf>, %19, %cst_7 [0] : vector<8x128xf32> to vector<128xf32>
    %21 = vector.shape_cast %20 : vector<128xf32> to vector<1x128xf32>
    %cst_8 = arith.constant 0xFF800000 : f32
    %22 = vector.broadcast %cst_8 : f32 to vector<1x128xf32>
    %23 = arith.cmpf oeq, %21, %22 : vector<1x128xf32>
    %cst_9 = arith.constant 0.000000e+00 : f32
    %24 = vector.broadcast %cst_9 : f32 to vector<1x128xf32>
    %25 = arith.select %23, %24, %21 : vector<1x128xi1>, vector<1x128xf32>
    %26 = vector.broadcast %25 : vector<1x128xf32> to vector<8x128xf32>
    %27 = arith.subf %19, %26 : vector<8x128xf32>
    %28 = math.exp %27 : vector<8x128xf32>
    %cst_10 = arith.constant dense<0.000000e+00> : vector<128xf32>
    %29 = vector.multi_reduction <add>, %28, %cst_10 [0] : vector<8x128xf32> to vector<128xf32>
    %30 = vector.shape_cast %29 : vector<128xf32> to vector<1x128xf32>
    %31 = math.log %30 : vector<1x128xf32>
    %32 = arith.addf %21, %31 : vector<1x128xf32>
    %33 = vector.extract_strided_slice %17 {offsets = [0, 0], sizes = [1, 128], strides = [1, 1]} : vector<8x128xi1> to vector<1x128xi1>
    %cst_11 = arith.constant 0.000000e+00 : f32
    %34 = vector.broadcast %cst_11 : f32 to vector<1x128xf32>
    %35 = arith.select %33, %32, %34 : vector<1x128xi1>, vector<1x128xf32>
    %36 = vector.shape_cast %35 : vector<1x128xf32> to vector<1x1x128xf32>
    %cst_12 = arith.constant dense<0.000000e+00> : vector<1xf32>
    %37 = vector.multi_reduction <add>, %36, %cst_12 [1, 2] : vector<1x1x128xf32> to vector<1xf32>
    %38 = vector.shape_cast %37 : vector<1xf32> to vector<1x1x1xf32>
    %39 = vector.extract %38[0, 0, 0] : f32 from vector<1x1x1xf32>
    %c0_i32 = arith.constant 0 : i32
    %40 = arith.cmpi eq, %arg1, %c0_i32 : i32
    %41 = arith.extui %40 : i1 to i32
    %c0_i32_13 = arith.constant 0 : i32
    %42 = arith.cmpi ne, %41, %c0_i32_13 : i32
    scf.if %42 {
      %cst_18 = arith.constant 0.000000e+00 : f32
      %47 = vector.broadcast %cst_18 : f32 to vector<8x128xf32>
      %c0_19 = arith.constant 0 : index
      %c0_20 = arith.constant 0 : index
      %48 = vector.load %arg5[%c0_19, %c0_20] : memref<8x128xf32, #tpu.memory_space<vmem>>, vector<8x128xf32>
      tpu.vector_store %arg5[%c0_19, %c0_20], %47 {strides = array<i32>} : memref<8x128xf32, #tpu.memory_space<vmem>>, vector<8x128xf32>,
    } else {
    }
    %c0_14 = arith.constant 0 : index
    %c0_15 = arith.constant 0 : index
    %43 = vector.load %arg5[%c0_14, %c0_15] : memref<8x128xf32, #tpu.memory_space<vmem>>, vector<8x128xf32>
    %44 = vector.broadcast %39 : f32 to vector<8x128xf32>
    %45 = arith.addf %43, %44 : vector<8x128xf32>
    %c0_16 = arith.constant 0 : index
    %c0_17 = arith.constant 0 : index
    %46 = vector.load %arg5[%c0_16, %c0_17] : memref<8x128xf32, #tpu.memory_space<vmem>>, vector<8x128xf32>
    tpu.vector_store %arg5[%c0_16, %c0_17], %45 {strides = array<i32>} : memref<8x128xf32, #tpu.memory_space<vmem>>, vector<8x128xf32>,
    return
  }
  func.func @transform_0(%arg0: i32, %arg1: i32) -> (i32, i32) {
    %c1_i32 = arith.constant 1 : i32
    %0 = arith.muli %arg0, %c1_i32 : i32
    %1 = arith.addi %0, %arg1 : i32
    %c0_i32 = arith.constant 0 : i32
    %2 = arith.minsi %1, %c0_i32 : i32
    %c0_i32_0 = arith.constant 0 : i32
    %c0_i32_1 = arith.constant 0 : i32
    return %c0_i32_0, %2 : i32, i32
  }
  func.func @transform_1(%arg0: i32, %arg1: i32) -> (i32, i32) {
    %c1_i32 = arith.constant 1 : i32
    %0 = arith.muli %arg0, %c1_i32 : i32
    %1 = arith.addi %0, %arg1 : i32
    %c0_i32 = arith.constant 0 : i32
    %2 = arith.minsi %1, %c0_i32 : i32
    %c0_i32_0 = arith.constant 0 : i32
    %c0_i32_1 = arith.constant 0 : i32
    return %c0_i32_0, %2 : i32, i32
  }
  func.func @transform_2(%arg0: i32, %arg1: i32) -> (i32, i32) {
    %c0_i32 = arith.constant 0 : i32
    %c0_i32_0 = arith.constant 0 : i32
    %c0_i32_1 = arith.constant 0 : i32
    return %c0_i32, %c0_i32_0 : i32, i32
  }
  func.func @transform_3(%arg0: i32, %arg1: i32) -> (i32, i32) {
    %c0_i32 = arith.constant 0 : i32
    %c0_i32_0 = arith.constant 0 : i32
    return %arg0, %c0_i32 : i32, i32
  }
}

</mosaic_0001>

<bundles_post_ra>
// kernel: tpu_custom_call.1
= control target key start
LH: loop header
LB: loop body
LE: loop exit
PB: predicated region body
PF: predicated region fallthrough
CT: control target
= control target key end

     0   :  { %8 = vsyncpa [#allocation3], 0  ;;  %s841_s0 = inlined_call_operand.vmem [shape: f32[8,16], index: 0, kind: input, shape index: {}]   ;;  %s842_s1 = inlined_call_operand.hbm [shape: f32[8,16], index: 1, kind: input, shape index: {}]   ;;  %s843_s2 = inlined_call_operand.vmem [shape: f32[8,1], index: 2, kind: input, shape index: {}]   ;;  %s844_s3 = inlined_call_operand.hbm [shape: f32[16,128], index: 3, kind: output, shape index: {}]  }
   0x1   :  { %10 = vsyncpa [#allocation3 + $0x1], 0 }
   0x2   :  { %11 = vsyncpa [#allocation4], 0 }
   0x3   :  { %13 = vsyncpa [#allocation4 + $0x1], 0  ;;  %s686_s12 = smov 0   ;;  %s688_s13 = smov 0  }
   0x4   :  { %s690_s14 = smov 0   ;;  %s692_s15 = smov 0  }
   0x5   :  { %s694_s16 = smov 0   ;;  %s696_s17 = smov 0  }
   0x6   :  { %s698_s18 = smov 0   ;;  %s700_s19 = smov 0  }
   0x7 LB: > { %s416_s20 = sadd.s32 4294967295, %s662_s19   ;;  %s417_s21 = sadd.s32 4294967294, %s662_s19   ;;  %s662_s19 = sphi %s700_s19, %s19_s19   ;;  %s658_s18 = sphi %s698_s18, %s855_s18   ;;  %s654_s17 = sphi %s696_s17, %s854_s17   ;;  %s650_s16 = sphi %s694_s16, %s831_s16   ;;  %s646_s15 = sphi %s692_s15, %s853_s15   ;;  %s642_s14 = sphi %s690_s14, %s852_s14   ;;  %s638_s13 = sphi %s688_s13, %s851_s13   ;;  %s634_s12 = sphi %s686_s12, %s850_s12  }
   0x8   : > { %s31_s22 = sadd.s32 1, %s658_s18  ;;  %p631_p1 = scmp.ne.s32.totalorder %s650_s16, 0 }
   0x9   : > { %p33_p0 = scmp.ge.s32.totalorder %s31_s22, 2  ;;  %p84_p2 = scmp.eq.s32.totalorder %s662_s19, 0 }
   0xa   : > { %p89_p3 = scmp.ne.s32.totalorder %s650_s16, %s646_s15  ;;  %p90_p5 = scmp.eq.s32.totalorder %s416_s20, 0 }
   0xb   : > { %s857_s22 = smov (%p33_p0, %s31_s22), 0  ;;  %p732_p4 = por %p631_p1, %p84_p2 }
   0xc   : > { %p736_p6 = por %p90_p5, %p89_p3  ;;  %s120_s25 = ssub.s32 %s658_s18, %s857_s22 }
   0xd   : > { %p121_p7 = scmp.eq.s32.totalorder %s120_s25, 0  ;;  %s123_s26 = sadd.s32 1, %s642_s14 }
   0xe   : > { %p133_p8 = scmp.ne.s32.totalorder %s642_s14, %s638_s13  ;;  %p134_p9 = scmp.eq.s32.totalorder %s416_s20, 1 }
   0xf   : > { %s744_s27 = scalar_select %p121_p7, %s642_s14, %s123_s26  }
  0x10   : > { %p139_p10 = scmp.ne.s32.totalorder %s638_s13, %s634_s12  ;;  %p140_p11 = scmp.eq.s32.totalorder %s417_s21, 1 }
  0x11   : > { %p750_p12 = por %p134_p9, %p133_p8  ;;  %p419_p13 = scmp.ge.s32.totalorder %s662_s19, 2 }
  0x12   : > { %p755_p0 = por %p140_p11, %p139_p10  ;;  %p448_p1 = scmp.lt.s32.totalorder %s662_s19, 2 }
  0x13   : > { %s189_s5 = sshll.u32 %s842_s1, 4  ;;  %s664_s6 = smov [#allocation2]   ;;  %s190_s5 = int_to_ptr.hbm [resolvable:$true] %s189_s5 }
  0x14   : > { %s191_s7 = sshll.u32 %s664_s6, 4  ;;  %p765_p2 = pnand %p448_p1, %p732_p4  ;;  %s192_s7 = int_to_ptr.vmem [resolvable:$true] %s191_s7 }
  0x15   : > { %p422_p3 = scmp.ge.s32.totalorder %s662_s19, 1  ;;  %p196_p5 = scmp.lt.s32.totalorder %s662_s19, 3 }
  0x16   : > { %s529_s9 = sshra.s32 %s190_s5, 4  ;;  %p533_p8 = pneg %p765_p2  ;;  %s530_s9 = int_to_ptr.hbm [resolvable:$true] %s529_s9 }
  0x17   : > { %s531_s10 = scalar_lea.hbm %s530_s9, 8  ;;  %s536_s20 = scalar_lea.hbm %s842_s1, 8 }
  0x18   : > { %p532_p7 = scmp.ne.s32.totalorder %s530_s9, %s531_s10  ;;  %p538_p11 = scmp.lt.s32.totalorder %s536_s20, %s531_s10 }
  0x1a   : > { %p534_p9 = pnand %p533_p8, %p532_p7 }
  0x1c   : > { %p535_p10 = pneg %p534_p9 }
  0x1e   : > { %p540_p4 = pnand %p538_p11, %p535_p10 }
  0x20   : > { %543 = shalt.err (!%p540_p4)
}
  0x21   : > { %443 = dma.hbm_to_vmem [thread:$0]  (!%p765_p2), %s190_s5, 128, %s192_s7, [#allocation3]  }
  0x22   : > { %p197_p1 = pnand %p422_p3, %p196_p5 }
  0x23   : > { %s202_s21 = sand.u32 (!%p197_p1), 1, %s650_s16  }
  0x24   : > { %200 = sbr.rel (%p197_p1) target bundleno = 394 (0x18a), region = 32  ;;  %s423_s23 = sshll.u32 (!%p197_p1), %s202_s21, 3 }
  0x25   : > { %s203_s25 = scalar_lea.sflag (!%p197_p1), [#allocation3], %s202_s21  ;;  %s206_s26 = scalar_lea.vmem (!%p197_p1), [#allocation2], %s423_s23 }
  0x29   : > { %624 = dma.done.wait (%p736_p6), %s203_s25, 128  }
  0x2a   : > { %626 = vsyncadd (%p736_p6), %s203_s25, 4294967168  ;;  %v665_v0 = vmov 0   ;;  %v253_v1 = vld [vmem:[%s843_s2] sm:$0xff]  ;;  %p238_p2 = scmp.lt.s32.totalorder %s654_s17, 0  ;;  %v263_v2 = vlaneseq  ;;  %s429_s24 = sshll.u32 %s654_s17, 7  ;;  %vm290_vm2 = vcmask 1040384  }
  0x2b   : > { %524 = vset.pattern.permute.xlu0 %v665_v0  ;;  %v265_v5 = vstv %s429_s24  ;;  %v252_v7 = vld [vmem:[%s206_s26] sm:$0xff]  ;;  %s234_s10 = sand.u32 1, %s638_s13   ;;  %s431_s15 = sshll.u32 %s654_s17, 3 }
  0x2c   : > { %258 = vperm.xlu0 %524, %v253_v1   ;;  %s239_s5 = scalar_select %p238_p2, %s654_s17, 0  ;;  %v264_v4 = vand.u32 127, %v263_v2 }
  0x2d   : > { %s424_s11 = sshll.u32 %s234_s10, 3  ;;  %s321_s23 = scalar_lea.hbm %s844_s3, %s431_s15 }
  0x2e   : > { %s859_s5 = smov (!%p238_p2, %s239_s5), 0  ;;  %v266_v8 = vadd.s32 %v265_v5, %v264_v4  ;;  %s236_s25 = scalar_lea.vmem [#allocation5], %s424_s11 }
  0x2f   : > { %s428_s6 = sshll.u32 %s859_s5, 3  ;;  %s323_s26 = sshll.u32 %s236_s25, 4  ;;  %s324_s26 = int_to_ptr.vmem [resolvable:$true] %s323_s26 }
  0x30   : > { %s243_s9 = scalar_lea.vmem %s841_s0, %s428_s6  ;;  %vm267_vm0 = vcmp.lt.s32.totalorder %v266_v8, 16  ;;  %s325_s30 = sshll.u32 %s321_s23, 4  ;;  %s326_s30 = int_to_ptr.hbm [resolvable:$true] %s325_s30 }
  0x31   : > { %v251_v3 = vld [vmem:[%s243_s9] sm:$0xff]  ;;  %s311_s5 = scalar_lea.sflag [#allocation4], %s234_s10  ;;  %s573_s6 = sshra.s32 %s326_s30, 4  ;;  %s574_s6 = int_to_ptr.hbm [resolvable:$true] %s573_s6 }
  0x32   : > { %v254_v6 = vsub.f32 0.0, %v251_v3  ;;  %s575_s7 = scalar_lea.hbm %s574_s6, 8  ;;  %s579_s9 = scalar_lea.hbm %s844_s3, 16 }
  0x33   : > { %p576_p6 = scmp.ne.s32.totalorder %s574_s6, %s575_s7  ;;  %p580_p7 = scmp.lt.s32.totalorder %s574_s6, %s844_s3 }
  0x34   : > { %v255_v9 = vsub.f32 %v254_v6, %v252_v7  ;;  %p581_p8 = scmp.lt.s32.totalorder %s579_s9, %s575_s7 }
  0x35   : > { %p577_p3 = pnand %p576_p6, %p750_p12 }
  0x36   : > { %p582_p9 = por %p581_p8, %p580_p7 }
  0x37   : > { %p578_p5 = pneg %p577_p3 }
  0x39   : > { %p583_p10 = pnand %p582_p9, %p578_p5 }
  0x9e   : > { %v259_v10 = vpop.permute.xlu0 %258 }
  0x9f   : > { %v261_v11 = vadd.f32 %v259_v10, %v255_v9 }
  0xa1   : > { %v268_v12 = vsel %vm267_vm0, %v261_v11, 0.0 }
  0xa2   : > { %v269_v13 = vrot.slane %v268_v12, 4 }
  0xa4   : > { %v270_v14 = vmax.f32 %v268_v12, %v269_v13 }
  0xa6   : > { %v271_v15 = vrot.slane %v270_v14, 2 }
  0xa8   : > { %v272_v16 = vmax.f32 %v270_v14, %v271_v15 }
  0xaa   : > { %v273_v17 = vrot.slane %v272_v16, 1 }
  0xac   : > { %v274_v18 = vmax.f32 %v272_v16, %v273_v17 }
  0xae   : > { %vm275_vm1 = vcmp.eq.f32.partialorder %v274_v18, -inf }
  0xaf   : > { %v276_v19 = vsel %vm275_vm1, 0.0, %v274_v18 }
  0xb0   : > { %v277_v20 = vsub.f32 %v268_v12, %v276_v19 }
  0xb2   : > { %v278_v21 = vmul.f32 1.442695, %v277_v20 }
  0xb4   : > { %525 = vpow2.f32 %v278_v21 }
  0xba   : > { %v526_v22 = vpop.eup %525 }
  0xbb   : > { %v280_v23 = vrot.slane %v526_v22, 4 }
  0xbd   : > { %v281_v24 = vadd.f32 %v526_v22, %v280_v23 }
  0xbf   : > { %v282_v25 = vrot.slane %v281_v24, 2 }
  0xc1   : > { %v283_v26 = vadd.f32 %v282_v25, %v281_v24 }
  0xc3   : > { %v284_v27 = vrot.slane %v283_v26, 1 }
  0xc5   : > { %v285_v28 = vadd.f32 %v284_v27, %v283_v26 }
  0xc7   : > { %527 = vlog2.f32 %v285_v28 }
  0xcd   : > { %v528_v29 = vpop.eup %527 }
  0xce   : > { %v287_v30 = vmul.f32 0.6931472, %v528_v29 }
  0xd0   : > { %v288_v31 = vadd.f32 %v287_v30, %v274_v18 }
  0xd2   : > { %v289_v32 = vsel %vm267_vm0, %v288_v31, 0.0 }
  0xd3   : > { %v291_v33 = vsel %vm290_vm2, %v289_v32, 0.0 }
  0xd4   : > { %292 = vadd.xlane.f32.xlu0 %v291_v33 }
 0x147   : > { %v293_v34 = vpop.xlane.xlu0 %292 }
 0x148   : > { %v294_v35 = vrot.slane %v293_v34, 4 }
 0x14a   : > { %v295_v36 = vadd.f32 %v294_v35, %v293_v34 }
 0x14c   : > { %v296_v37 = vrot.slane %v295_v36, 2 }
 0x14e   : > { %v297_v38 = vadd.f32 %v296_v37, %v295_v36 }
 0x150   : > { %v298_v39 = vrot.slane %v297_v38, 1 }
 0x152   : > { %v299_v40 = vadd.f32 %v298_v39, %v297_v38 }
 0x154   : > { %434 = vpush %v299_v40 }
 0x185   : > { %s435_s4 = spop %434 }
 0x186   : > { %v307_v41 = vstv %s435_s4 }
 0x187   : > { %309 = vst [vmem:[%s236_s25] sm:$0xff] %v307_v41 }
 0x188   : > { %586 = shalt.err (!%p583_p10)
}
 0x189   : > { %438 = dma.vmem_to_hbm [thread:$0]  (%p750_p12), %s324_s26, 128, %s326_s30, %s311_s5  }
 0x18a PF: > { %s337_s10 = sand.u32 1, %s634_s12   ;;  %p445_p11 = pnand %p419_p13, %p755_p0 }
 0x18b   : > { %s338_s15 = scalar_lea.sflag [#allocation4], %s337_s10 }
 0x18c   : > { %p446_p4 = pneg %p445_p11 }
 0x18e   : > { %628 = dma.done.wait (%p446_p4), %s338_s15, 128  }
 0x18f   : > { %630 = vsyncadd (%p446_p4), %s338_s15, 4294967168  ;;  %s19_s19 = sadd.s32 1, %s662_s19   ;;  %s850_s12 = smov %s638_s13 }
 0x190   : > { %p16_p1 = scmp.ge.s32.totalorder %s19_s19, 4   ;;  %s851_s13 = smov %s642_s14 }
 0x191   : > { %s852_s14 = smov %s744_s27  ;;  %s853_s15 = smov %s650_s16 }
 0x192   : > { %s831_s16 = smov 0   ;;  %s854_s17 = smov %s658_s18 }
 0x193   : > { %s855_s18 = smov %s857_s22  ;;  %18 = sbr.rel (!%p16_p1) target bundleno = 7 (0x7), region = 84 }
 0x198   :  { %344 = vsyncpa [#allocation3], 1 }
 0x199   :  { %346 = vsyncpa [#allocation3 + $0x1], 1 }
 0x19a   :  { %347 = vsyncpa [#allocation4], 1 }
 0x19b   :  { %349 = vsyncpa [#allocation4 + $0x1], 1 }

</bundles_post_ra>
